<compile_context>
chip_gen: v7x
topology: tpu7x:2x2x1
jax: 0.10.0
libtpu: 0.0.40
codegen_flags: <defaults>
</compile_context>

<pallas_src>
import functools

import jax
import jax.numpy as jnp
from jax.experimental import pallas as pl
from jax.experimental.pallas import tpu as pltpu

LN_EPS = 1e-5


def _pick_block_n(dim_out, dim_in, w_itemsize, do_residual, target_bytes):
    """Choose the dim_out tile so a weight block stays <= target_bytes."""
    if dim_out * dim_in * w_itemsize <= target_bytes:
        return dim_out                       # weight fits: keep it fully resident
    bn = max(128, (target_bytes // (dim_in * w_itemsize)) // 128 * 128)
    bn = min(bn, dim_out)
    if do_residual:
        # Residual path slices x along lanes by j*block_n; keep block_n an exact
        # divisor of dim_out so that slice can never read out of bounds.
        while bn >= 128 and dim_out % bn != 0:
            bn -= 128
        if bn < 128 or dim_out % bn != 0:
            return dim_out                   # fall back: no N tiling
    return bn


def _ff_kernel(*refs, block_n, add_norm, add_residual, bf16_matmul):
    if add_norm:
        x_ref, w_ref, b_ref, g_ref, bt_ref, o_ref = refs
    else:
        x_ref, w_ref, b_ref, o_ref = refs

    x = x_ref[...]                           # (block_m, dim_in)

    if add_norm:
        xf = x.astype(jnp.float32)
        mean = jnp.mean(xf, axis=-1, keepdims=True)
        cen = xf - mean
        var = jnp.mean(cen * cen, axis=-1, keepdims=True)
        h = cen * jax.lax.rsqrt(var + LN_EPS)
        h = h * g_ref[...].astype(jnp.float32) + bt_ref[...].astype(jnp.float32)
        h = h.astype(x.dtype)                # bf16 inputs keep the native bf16 MXU path
    else:
        h = x

    w = w_ref[...]                           # (block_n, dim_in) -- PyTorch layout, no transpose
    if bf16_matmul and h.dtype == jnp.float32:
        h = h.astype(jnp.bfloat16)
        w = w.astype(jnp.bfloat16)
    elif w.dtype != h.dtype:
        w = w.astype(h.dtype)

    # y = h @ w.T  (contract last dims of both) -> (block_m, block_n), f32 accumulate.
    y = jax.lax.dot_general(h, w, (((1,), (1,)), ((), ())),
                            preferred_element_type=jnp.float32)
    y = jnp.maximum(y + b_ref[...].astype(jnp.float32), 0.0)
    # Dropout is identity in eval mode.

    if add_residual:
        if block_n == x.shape[-1]:           # single N block: residual is the whole row
            res = x
        else:                                # block_n divides dim_out == dim_in here
            n0 = pl.multiple_of(pl.program_id(1) * block_n, 128)
            res = x_ref[:, pl.ds(n0, block_n)]
        y = y + res.astype(jnp.float32)

    o_ref[...] = y.astype(o_ref.dtype)


@functools.partial(
    jax.jit,
    static_argnames=("add_norm", "add_residual", "block_m_cap",
                     "bf16_matmul", "weight_block_bytes"))
def one_layer_feed_forward(features, params, *, add_norm=False, add_residual=False,
                           block_m_cap=512, bf16_matmul=False,
                           weight_block_bytes=8 * 1024 * 1024):
    """Pallas implementation of OneLayerFeedForward.forward (eval mode).

    params: {"w": (dim_out, dim_in)  PyTorch Linear weight (not transposed),
             "b": (dim_out,),
             "ln_g"/"ln_b": (dim_in,)  only required when add_norm=True}
    """
    orig_shape = features.shape
    dim_in = orig_shape[-1]
    w = params["w"]
    b = params["b"]
    dim_out = w.shape[0]
    # Matches the PyTorch condition: residual only when dims agree.
    do_residual = bool(add_residual) and (dim_in == dim_out)

    # Flatten all leading dims into the matmul M dimension (single MXU problem).
    x2 = features.reshape(-1, dim_in)
    M = x2.shape[0]

    # Row tiling: full-extent single block at small M (no (8,128) constraint when the
    # block equals the array dim); otherwise 256-aligned blocks with a ragged tail.
    if M <= block_m_cap:
        block_m = M
    else:
        block_m = max(8, block_m_cap - block_m_cap % 8)
    grid_m = pl.cdiv(M, block_m)

    # dim_out tiling bounds the resident weight block (v7x: 64 MiB VMEM).
    block_n = _pick_block_n(dim_out, dim_in, w.dtype.itemsize, do_residual,
                            weight_block_bytes)
    grid_n = pl.cdiv(dim_out, block_n)

    b2 = b.reshape(1, dim_out)

    inputs = [x2, w, b2]
    in_specs = [
        pl.BlockSpec((block_m, dim_in), lambda i, j: (i, 0)),   # x rows (resident over j)
        pl.BlockSpec((block_n, dim_in), lambda i, j: (j, 0)),   # weight (PyTorch layout)
        pl.BlockSpec((1, block_n), lambda i, j: (0, j)),        # bias
    ]
    if add_norm:
        inputs += [params["ln_g"].reshape(1, dim_in),
                   params["ln_b"].reshape(1, dim_in)]
        in_specs += [pl.BlockSpec((1, dim_in), lambda i, j: (0, 0)),   # gamma (resident)
                     pl.BlockSpec((1, dim_in), lambda i, j: (0, 0))]   # beta  (resident)

    kernel = functools.partial(_ff_kernel, block_n=block_n, add_norm=add_norm,
                               add_residual=do_residual, bf16_matmul=bf16_matmul)

    # Advisory cost estimate for XLA's scheduler.
    flops = 2 * M * dim_in * dim_out + (8 * M * dim_in if add_norm else 0)
    bytes_accessed = (x2.size * x2.dtype.itemsize
                      + w.size * w.dtype.itemsize
                      + b.size * b.dtype.itemsize
                      + M * dim_out * features.dtype.itemsize
                      + (2 * dim_in * 4 if add_norm else 0))
    cost = pl.CostEstimate(flops=int(flops),
                           transcendentals=int(M if add_norm else 0),
                           bytes_accessed=int(bytes_accessed))

    # Raise the scoped VMEM limit only as far as the (double-buffered) blocks need.
    xb = features.dtype.itemsize
    blk_vmem = (2 * block_m * dim_in * xb          # x blocks
                + 2 * block_n * dim_in * w.dtype.itemsize   # weight blocks
                + 2 * block_m * block_n * xb       # output blocks
                + 4 * dim_in * 4 + 4 * block_n * 4)          # gamma/beta/bias
    vmem_limit = int(min(100 * 2**20,
                         max(32 * 2**20, int(blk_vmem * 1.25) + (4 << 20))))

    out = pl.pallas_call(
        kernel,
        out_shape=jax.ShapeDtypeStruct((M, dim_out), features.dtype),
        grid=(grid_m, grid_n),
        in_specs=in_specs,
        out_specs=pl.BlockSpec((block_m, block_n), lambda i, j: (i, j)),
        compiler_params=pltpu.CompilerParams(
            dimension_semantics=("parallel", "arbitrary"),
            vmem_limit_bytes=vmem_limit),
        cost_estimate=cost,
    )(*inputs)

    return out.reshape(orig_shape[:-1] + (dim_out,))


def reference_jax(features, params, *, add_norm, add_residual):
    x = features.astype(jnp.float32)
    h = x
    if add_norm:
        mean = jnp.mean(x, axis=-1, keepdims=True)
        var = jnp.mean((x - mean) ** 2, axis=-1, keepdims=True)
        h = ((x - mean) / jnp.sqrt(var + LN_EPS)
             * params["ln_g"].astype(jnp.float32) + params["ln_b"].astype(jnp.float32))
    y = jnp.dot(h, params["w"].astype(jnp.float32).T,
                precision=jax.lax.Precision.HIGHEST) + params["b"].astype(jnp.float32)
    y = jnp.maximum(y, 0.0)
    if add_residual and params["w"].shape[0] == features.shape[-1]:
        y = y + x
    return y.astype(features.dtype)


if __name__ == "__main__":
    # Small shapes consistent with the module: batch=2, seq=16, hidden=32.
    B, N, dim_in, dim_out = 2, 16, 32, 32

    key = jax.random.PRNGKey(0)
    k_x, k_w, k_b, k_g, k_bt, k_w2, k_b2, k_x3 = jax.random.split(key, 8)

    features = jax.random.normal(k_x, (B, N, dim_in), dtype=jnp.float32)

    # Config A: add_norm=True, add_residual=True, dim_in == dim_out.
    params_full = {
        "w": jax.random.normal(k_w, (dim_out, dim_in), dtype=jnp.float32) * 0.1,
        "b": jax.random.normal(k_b, (dim_out,), dtype=jnp.float32) * 0.01,
        "ln_g": 1.0 + 0.05 * jax.random.normal(k_g, (dim_in,), dtype=jnp.float32),
        "ln_b": 0.05 * jax.random.normal(k_bt, (dim_in,), dtype=jnp.float32),
    }
    out = one_layer_feed_forward(features, params_full,
                                 add_norm=True, add_residual=True)
    out = jax.block_until_ready(out)
    ref = reference_jax(features, params_full, add_norm=True, add_residual=True)
    assert out.shape == (B, N, dim_out)
    assert jnp.allclose(out, ref, atol=1e-3, rtol=1e-3), "mismatch (norm+residual)"

    # Config B: module defaults (no norm, no residual), rectangular projection.
    dim_out2 = 64
    params_plain = {
        "w": jax.random.normal(k_w2, (dim_out2, dim_in), dtype=jnp.float32) * 0.1,
        "b": jax.random.normal(k_b2, (dim_out2,), dtype=jnp.float32) * 0.01,
    }
    out2 = one_layer_feed_forward(features, params_plain,
                                  add_norm=False, add_residual=False)
    out2 = jax.block_until_ready(out2)
    ref2 = reference_jax(features, params_plain, add_norm=False, add_residual=False)
    assert out2.shape == (B, N, dim_out2)
    assert jnp.allclose(out2, ref2, atol=1e-3, rtol=1e-3), "mismatch (plain FF)"

    # Config C: multi-block + ragged last row-block (M = 39 not a multiple of 16).
    features3 = jax.random.normal(k_x3, (3, 13, dim_in), dtype=jnp.float32)
    out3 = one_layer_feed_forward(features3, params_full,
                                  add_norm=True, add_residual=True, block_m_cap=16)
    out3 = jax.block_until_ready(out3)
    ref3 = reference_jax(features3, params_full, add_norm=True, add_residual=True)
    assert out3.shape == (3, 13, dim_out)
    assert jnp.allclose(out3, ref3, atol=1e-3, rtol=1e-3), "mismatch (ragged blocks)"

    print("KERNEL_OK")
</pallas_src>

<mosaic_0001>
module attributes {stable_mosaic.version = 11 : i64} {
  func.func @_ff_kernel(%arg0: i32, %arg1: i32, %arg2: memref<32x32xf32, #tpu.memory_space<vmem>>, %arg3: memref<32x32xf32, #tpu.memory_space<vmem>>, %arg4: memref<1x32xf32, #tpu.memory_space<vmem>>, %arg5: memref<1x32xf32, #tpu.memory_space<vmem>>, %arg6: memref<1x32xf32, #tpu.memory_space<vmem>>, %arg7: memref<32x32xf32, #tpu.memory_space<vmem>>) attributes {dimension_semantics = [#tpu.dimension_semantics<parallel>, #tpu.dimension_semantics<arbitrary>], iteration_bounds = array<i64: 1, 1>, scalar_prefetch = 0 : i64, scratch_operands = 0 : i64, tpu.core_type = #tpu.core_type<tc>, window_params = [{transform_indices = @transform_0, window_bounds = array<i64: 32, 32>}, {transform_indices = @transform_1, window_bounds = array<i64: 32, 32>}, {transform_indices = @transform_2, window_bounds = array<i64: 1, 32>}, {pipeline_mode = #tpu.pipeline_mode<synchronous>, transform_indices = @transform_3, window_bounds = array<i64: 1, 32>}, {pipeline_mode = #tpu.pipeline_mode<synchronous>, transform_indices = @transform_4, window_bounds = array<i64: 1, 32>}, {transform_indices = @transform_5, window_bounds = array<i64: 32, 32>}]} {
    %c0 = arith.constant 0 : index
    %c0_0 = arith.constant 0 : index
    %0 = vector.load %arg2[%c0, %c0_0] : memref<32x32xf32, #tpu.memory_space<vmem>>, vector<32x32xf32>
    %cst = arith.constant dense<0.000000e+00> : vector<32xf32>
    %1 = vector.multi_reduction <add>, %0, %cst [1] : vector<32x32xf32> to vector<32xf32>
    %2 = vector.shape_cast %1 : vector<32xf32> to vector<32x1xf32>
    %cst_1 = arith.constant 3.200000e+01 : f32
    %3 = vector.broadcast %cst_1 : f32 to vector<32x1xf32>
    %4 = arith.divf %2, %3 : vector<32x1xf32>
    %5 = vector.broadcast %4 : vector<32x1xf32> to vector<32x32xf32>
    %6 = arith.subf %0, %5 : vector<32x32xf32>
    %7 = arith.mulf %6, %6 : vector<32x32xf32>
    %cst_2 = arith.constant dense<0.000000e+00> : vector<32xf32>
    %8 = vector.multi_reduction <add>, %7, %cst_2 [1] : vector<32x32xf32> to vector<32xf32>
    %9 = vector.shape_cast %8 : vector<32xf32> to vector<32x1xf32>
    %cst_3 = arith.constant 3.200000e+01 : f32
    %10 = vector.broadcast %cst_3 : f32 to vector<32x1xf32>
    %11 = arith.divf %9, %10 : vector<32x1xf32>
    %cst_4 = arith.constant 9.99999974E-6 : f32
    %12 = vector.broadcast %cst_4 : f32 to vector<32x1xf32>
    %13 = arith.addf %11, %12 : vector<32x1xf32>
    %14 = math.rsqrt %13 : vector<32x1xf32>
    %15 = vector.broadcast %14 : vector<32x1xf32> to vector<32x32xf32>
    %16 = arith.mulf %6, %15 : vector<32x32xf32>
    %c0_5 = arith.constant 0 : index
    %c0_6 = arith.constant 0 : index
    %17 = vector.load %arg5[%c0_5, %c0_6] : memref<1x32xf32, #tpu.memory_space<vmem>>, vector<1x32xf32>
    %18 = vector.broadcast %17 : vector<1x32xf32> to vector<32x32xf32>
    %19 = arith.mulf %16, %18 : vector<32x32xf32>
    %c0_7 = arith.constant 0 : index
    %c0_8 = arith.constant 0 : index
    %20 = vector.load %arg6[%c0_7, %c0_8] : memref<1x32xf32, #tpu.memory_space<vmem>>, vector<1x32xf32>
    %21 = vector.broadcast %20 : vector<1x32xf32> to vector<32x32xf32>
    %22 = arith.addf %19, %21 : vector<32x32xf32>
    %c0_9 = arith.constant 0 : index
    %c0_10 = arith.constant 0 : index
    %23 = vector.load %arg3[%c0_9, %c0_10] : memref<32x32xf32, #tpu.memory_space<vmem>>, vector<32x32xf32>
    %cst_11 = arith.constant dense<0.000000e+00> : vector<32x32xf32>
    %24 = tpu.matmul %22, %23, %cst_11 {dimension_numbers = #tpu.dot_dimension_numbers<[1], [1], [0], [0], [0, 0, 1, 0], [], []>} : vector<32x32xf32>, vector<32x32xf32>, vector<32x32xf32> -> vector<32x32xf32>
    %c0_12 = arith.constant 0 : index
    %c0_13 = arith.constant 0 : index
    %25 = vector.load %arg4[%c0_12, %c0_13] : memref<1x32xf32, #tpu.memory_space<vmem>>, vector<1x32xf32>
    %26 = vector.broadcast %25 : vector<1x32xf32> to vector<32x32xf32>
    %27 = arith.addf %24, %26 : vector<32x32xf32>
    %cst_14 = arith.constant 0.000000e+00 : f32
    %28 = vector.broadcast %cst_14 : f32 to vector<32x32xf32>
    %29 = arith.maximumf %27, %28 : vector<32x32xf32>
    %30 = arith.addf %29, %0 : vector<32x32xf32>
    %c0_15 = arith.constant 0 : index
    %c0_16 = arith.constant 0 : index
    %31 = vector.load %arg7[%c0_15, %c0_16] : memref<32x32xf32, #tpu.memory_space<vmem>>, vector<32x32xf32>
    tpu.vector_store %arg7[%c0_15, %c0_16], %30 {strides = array<i32>} : memref<32x32xf32, #tpu.memory_space<vmem>>, vector<32x32xf32>,
    return
  }
  func.func @transform_0(%arg0: i32, %arg1: i32) -> (i32, i32) {
    %c0_i32 = arith.constant 0 : i32
    %c0_i32_0 = arith.constant 0 : i32
    return %arg0, %c0_i32 : i32, i32
  }
  func.func @transform_1(%arg0: i32, %arg1: i32) -> (i32, i32) {
    %c0_i32 = arith.constant 0 : i32
    %c0_i32_0 = arith.constant 0 : i32
    return %arg1, %c0_i32 : i32, i32
  }
  func.func @transform_2(%arg0: i32, %arg1: i32) -> (i32, i32) {
    %c0_i32 = arith.constant 0 : i32
    %c0_i32_0 = arith.constant 0 : i32
    return %c0_i32, %arg1 : i32, i32
  }
  func.func @transform_3(%arg0: i32, %arg1: i32) -> (i32, i32) {
    %c0_i32 = arith.constant 0 : i32
    %c0_i32_0 = arith.constant 0 : i32
    %c0_i32_1 = arith.constant 0 : i32
    return %c0_i32, %c0_i32_0 : i32, i32
  }
  func.func @transform_4(%arg0: i32, %arg1: i32) -> (i32, i32) {
    %c0_i32 = arith.constant 0 : i32
    %c0_i32_0 = arith.constant 0 : i32
    %c0_i32_1 = arith.constant 0 : i32
    return %c0_i32, %c0_i32_0 : i32, i32
  }
  func.func @transform_5(%arg0: i32, %arg1: i32) -> (i32, i32) {
    %c0_i32 = arith.constant 0 : i32
    return %arg0, %arg1 : i32, i32
  }
}

</mosaic_0001>

<bundles_post_ra>
// kernel: one_layer_feed_forward.1
= control target key start
LH: loop header
LB: loop body
LE: loop exit
PB: predicated region body
PF: predicated region fallthrough
CT: control target
= control target key end

     0   :  { %10 = vsyncpa [#allocation3], 0  ;;  %s540_s0 = inlined_call_operand.hbm [shape: f32[32,32], index: 0, kind: input, shape index: {}]   ;;  %s541_s1 = inlined_call_operand.hbm [shape: f32[32,32], index: 1, kind: input, shape index: {}]   ;;  %s542_s2 = inlined_call_operand.vmem [shape: f32[1,32], index: 2, kind: input, shape index: {}]   ;;  %s543_s3 = inlined_call_operand.vmem [shape: f32[1,32], index: 3, kind: input, shape index: {}]   ;;  %s544_s4 = inlined_call_operand.vmem [shape: f32[1,32], index: 4, kind: input, shape index: {}]   ;;  %s545_s5 = inlined_call_operand.hbm [shape: f32[32,32], index: 5, kind: output, shape index: {}]  }
   0x1   :  { %11 = vsyncpa [#allocation6], 0 }
   0x2   :  { %12 = vsyncpa [#allocation4], 0  ;;  %s413_s18 = smov [#allocation2]   ;;  %s341_s22 = scalar_lea.hbm %s540_s0, 512 }
   0x3   :  { %s18_s19 = sshll.u32 %s413_s18, 4  ;;  %p342_p0 = scmp.ne.s32.totalorder %s540_s0, %s341_s22  ;;  %s19_s19 = int_to_ptr.vmem [resolvable:$true] %s18_s19 }
   0x4   :  { %p345_p1 = scmp.lt.u32.totalorder %s341_s22, %s540_s0 }
   0x6   :  { %p347_p2 = pnand %p345_p1, %p342_p0 }
   0x8   :  { %350 = shalt.err (!%p347_p2)
}
   0x9   :  { %s351_s27 = scalar_lea.vmem %s19_s19, 512  ;;  %p356_p4 = scmp.lt.s32.totalorder %s19_s19, %s19_s19 }
   0xa   :  { %p352_p3 = scmp.ne.s32.totalorder %s19_s19, %s351_s27  ;;  %p357_p5 = scmp.lt.s32.totalorder %s351_s27, %s351_s27 }
   0xc   :  { %p358_p6 = por %p357_p5, %p356_p4 }
   0xe   :  { %p359_p7 = pnand %p358_p6, %p352_p3 }
  0x10   :  { %362 = shalt.err (!%p359_p7)
}
  0x11   :  { %s414_s28 = smov 128   ;;  %s415_s29 = smov 8  }
  0x12   :  { %24 = dma.hbm_to_vmem [thread:$0]  %s540_s0, 512, %s19_s19, [#allocation3], %s414_s28, %s414_s28, %s415_s29  }
  0x13   :  { %s416_s7 = smov [#allocation5]   ;;  %s363_s11 = scalar_lea.hbm %s541_s1, 512 }
  0x14   :  { %s30_s8 = sshll.u32 %s416_s7, 4  ;;  %p364_p8 = scmp.ne.s32.totalorder %s541_s1, %s363_s11  ;;  %s31_s8 = int_to_ptr.vmem [resolvable:$true] %s30_s8 }
  0x15   :  { %p367_p9 = scmp.lt.u32.totalorder %s363_s11, %s541_s1 }
  0x17   :  { %p369_p10 = pnand %p367_p9, %p364_p8 }
  0x19   :  { %372 = shalt.err (!%p369_p10)
}
  0x1a   :  { %s373_s16 = scalar_lea.vmem %s31_s8, 512  ;;  %p378_p12 = scmp.lt.s32.totalorder %s31_s8, %s31_s8 }
  0x1b   :  { %p374_p11 = scmp.ne.s32.totalorder %s31_s8, %s373_s16  ;;  %p379_p13 = scmp.lt.s32.totalorder %s373_s16, %s373_s16 }
  0x1d   :  { %p380_p0 = por %p379_p13, %p378_p12 }
  0x1f   :  { %p381_p1 = pnand %p380_p0, %p374_p11 }
  0x21   :  { %384 = shalt.err (!%p381_p1)
}
  0x22   :  { %36 = dma.hbm_to_vmem [thread:$0]  %s541_s1, 512, %s31_s8, [#allocation6], %s414_s28, %s414_s28, %s415_s29  }
  0x23   :  { %407 = dma.done.wait [#allocation3], 512  }
  0x24   :  { %408 = vsyncadd [#allocation3], 4294966784 }
  0x25   :  { %409 = dma.done.wait [#allocation6], 512  }
  0x26   :  { %410 = vsyncadd [#allocation6], 4294966784  ;;  %vm53_vm0 = vcmask 261120   ;;  %v478_v0 = vld [vmem:[#allocation2] sm:$0xff]  ;;  %v480_v1 = vld [vmem:[#allocation2 + $0x8] sm:$0xff]  ;;  %s417_s21 = smov [#allocation7]  }
  0x27   :  { %v482_v2 = vld [vmem:[#allocation2 + $0x10] sm:$0xff]  ;;  %v54_v3 = vsel %vm53_vm0, %v478_v0, 0.0  ;;  %v57_v4 = vsel %vm53_vm0, %v480_v1, 0.0  ;;  %v488_v5 = vld [vmem:[#allocation2 + $0x18] sm:$0xff]  ;;  %v129_v28 = vld [vmem:[#allocation5] sm:$0xff]  ;;  %s266_s22 = sshll.u32 %s417_s21, 4  ;;  %s267_s22 = int_to_ptr.vmem [resolvable:$true] %s266_s22 }
  0x28   :  { %55 = vadd.xlane.f32.xlu0 %v54_v3  ;;  %58 = vadd.xlane.f32.xlu1 %v57_v4  ;;  %v60_v6 = vsel %vm53_vm0, %v482_v2, 0.0  ;;  %v63_v7 = vsel %vm53_vm0, %v488_v5, 0.0  ;;  %v130_v29 = vld [vmem:[#allocation5 + $0x8] sm:$0xff]  ;;  %vm313_vm1 = vmpackc.low %vm53_vm0, %vm53_vm0  ;;  %v131_v31 = vld [vmem:[#allocation5 + $0x10] sm:$0xff]  ;;  %p390_p3 = scmp.lt.s32.totalorder %s267_s22, %s267_s22 }
  0x29   :  { %v312_v30 = vpack.c.bf16 %v130_v29, %v129_v28  ;;  %v132_v32 = vld [vmem:[#allocation5 + $0x18] sm:$0xff]  ;;  %v279_v47 = vld [vmem:[%s543_s3] ss:$0 sm:$0xff] }
  0x2a   :  { %v318_v33 = vpack.c.bf16 %v132_v32, %v131_v31  ;;  %v280_v49 = vld [vmem:[%s544_s4] ss:$0 sm:$0xff] }
  0x2b   :  { %314 = vmatprep.subr.msk.bf16.mxu0 %vm313_vm1, %v312_v30  ;;  %324 = vmatprep.subr.msk.bf16.mxu1 %vm313_vm1, %v312_v30  ;;  %v281_v3 = vld [vmem:[%s542_s2] ss:$0 sm:$0xff]  ;;  %s385_s2 = scalar_lea.vmem %s267_s22, 512 }
  0x2c   :  { %61 = vadd.xlane.f32.xlu0 %v60_v6  ;;  %64 = vadd.xlane.f32.xlu1 %v63_v7  ;;  %p386_p2 = scmp.ne.s32.totalorder %s267_s22, %s385_s2  ;;  %p391_p4 = scmp.lt.s32.totalorder %s385_s2, %s385_s2 }
  0x2d   :  { %317 = vmatpush3.bf16.xpose.msk.msra.mxu0 %vm313_vm1, %v312_v30  ;;  %326 = vmatpush3.bf16.xpose.msk.msra.mxu1 %vm313_vm1, %v312_v30 }
  0x2e   :  { %320 = vmatprep.subr.msk.bf16.mxu0 %vm313_vm1, %v318_v33  ;;  %325 = vmatprep.subr.msk.bf16.mxu1 %vm313_vm1, %v318_v33  ;;  %p392_p5 = por %p391_p4, %p390_p3 }
  0x30   :  { %p393_p6 = pnand %p392_p5, %p386_p2 }
  0x35   :  { %323 = vmatpush3.bf16.xpose.msk.msra.mxu0 %vm313_vm1, %v318_v33  ;;  %327 = vmatpush3.bf16.xpose.msk.msra.mxu1 %vm313_vm1, %v318_v33 }
  0xb5   :  { %v56_v8 = vpop.xlane.xlu0 %55  ;;  %v59_v9 = vpop.xlane.xlu1 %58 }
  0xb6   :  { %v67_v10 = vmul.f32 0.03125, %v56_v8  ;;  %v68_v11 = vmul.f32 0.03125, %v59_v9 }
  0xb8   :  { %v71_v12 = vsub.f32 %v478_v0, %v67_v10  ;;  %v72_v13 = vsub.f32 %v480_v1, %v68_v11 }
  0xb9   :  { %v62_v14 = vpop.xlane.xlu0 %61  ;;  %v65_v15 = vpop.xlane.xlu1 %64 }
  0xba   :  { %v69_v16 = vmul.f32 0.03125, %v62_v14  ;;  %v70_v17 = vmul.f32 0.03125, %v65_v15  ;;  %v75_v18 = vmul.f32 %v71_v12, %v71_v12  ;;  %v76_v19 = vmul.f32 %v72_v13, %v72_v13 }
  0xbc   :  { %v73_v20 = vsub.f32 %v482_v2, %v69_v16  ;;  %v74_v21 = vsub.f32 %v488_v5, %v70_v17  ;;  %v79_v22 = vsel %vm53_vm0, %v75_v18, 0.0  ;;  %v82_v23 = vsel %vm53_vm0, %v76_v19, 0.0 }
  0xbd   :  { %80 = vadd.xlane.f32.xlu0 %v79_v22 }
  0xbe   :  { %v77_v24 = vmul.f32 %v73_v20, %v73_v20  ;;  %v78_v25 = vmul.f32 %v74_v21, %v74_v21 }
  0xc0   :  { %v85_v26 = vsel %vm53_vm0, %v77_v24, 0.0  ;;  %v88_v27 = vsel %vm53_vm0, %v78_v25, 0.0 }
  0xc1   :  { %83 = vadd.xlane.f32.xlu0 %v82_v23  ;;  %86 = vadd.xlane.f32.xlu1 %v85_v26 }
  0xc5   :  { %89 = vadd.xlane.f32.xlu1 %v88_v27 }
 0x14a   :  { %v81_v34 = vpop.xlane.xlu0 %80 }
 0x14b   :  { %v91_v35 = vmul.f32 0.03125, %v81_v34 }
 0x14d   :  { %v95_v36 = vadd.f32 1e-05, %v91_v35 }
 0x14e   :  { %v87_v37 = vpop.xlane.xlu1 %86  ;;  %v84_v38 = vpop.xlane.xlu0 %83 }
 0x14f   :  { %333 = vrsqrt.f32 %v95_v36  ;;  %v93_v39 = vmul.f32 0.03125, %v87_v37  ;;  %v92_v40 = vmul.f32 0.03125, %v84_v38 }
 0x151   :  { %v97_v41 = vadd.f32 1e-05, %v93_v39  ;;  %v96_v42 = vadd.f32 1e-05, %v92_v40 }
 0x152   :  { %v90_v43 = vpop.xlane.xlu1 %89 }
 0x153   :  { %335 = vrsqrt.f32 %v97_v41  ;;  %v94_v44 = vmul.f32 0.03125, %v90_v43 }
 0x154   :  { %337 = vrsqrt.f32 %v96_v42 }
 0x155   :  { %v98_v45 = vadd.f32 1e-05, %v94_v44 }
 0x157   :  { %339 = vrsqrt.f32 %v98_v45 }
 0x159   :  { %v334_v46 = vpop.eup %333 }
 0x15a   :  { %v103_v48 = vmul.f32 %v334_v46, %v71_v12 }
 0x15c   :  { %v114_v50 = vmul.f32 %v279_v47, %v103_v48 }
 0x15d   :  { %v336_v51 = vpop.eup %335 }
 0x15e   :  { %v338_v52 = vpop.eup %337  ;;  %v125_v53 = vadd.f32 %v280_v49, %v114_v50  ;;  %v105_v54 = vmul.f32 %v336_v51, %v73_v20 }
 0x15f   :  { %v104_v55 = vmul.f32 %v338_v52, %v72_v13 }
 0x160   :  { %306 = vmatprep.mubr.msk.f32.mxu0 %vm53_vm0, %v125_v53  ;;  %v116_v56 = vmul.f32 %v279_v47, %v105_v54 }
 0x161   :  { %v340_v57 = vpop.eup %339  ;;  %v115_v58 = vmul.f32 %v279_v47, %v104_v55 }
 0x162   :  { %v127_v59 = vadd.f32 %v280_v49, %v116_v56  ;;  %v106_v60 = vmul.f32 %v340_v57, %v74_v21 }
 0x163   :  { %v126_v61 = vadd.f32 %v280_v49, %v115_v58 }
 0x164   :  { %309 = vmatprep.mubr.msk.f32.mxu1 %vm53_vm0, %v127_v59  ;;  %v117_v62 = vmul.f32 %v279_v47, %v106_v60 }
 0x165   :  { %307 = vmatmul.mubr.msk.f32.vlgmr.msra.gmra.mrb[0].mxu0 %vm53_vm0, %v126_v61 }
 0x166   :  { %v128_v63 = vadd.f32 %v280_v49, %v117_v62 }
 0x168   :  { %310 = vmatmul.mubr.msk.f32.vlgmr.msra.gmra.mrb[0].mxu1 %vm53_vm0, %v128_v63 }
 0x238   :  { %v308_v4 = vpop.f32.mrb[0].mxu0 }
 0x239   :  { %v236_v6 = vadd.f32 %v308_v4, %v281_v3  ;;  %v230_v7 = vpop.f32.mrb[1].mxu0 }
 0x23a   :  { %v231_v8 = vadd.f32 %v281_v3, %v230_v7 }
 0x23b   :  { %v250_v9 = vmax.f32 %v236_v6, 0.0  ;;  %v311_v10 = vpop.f32.mrb[0].mxu1 }
 0x23c   :  { %v249_v11 = vmax.f32 %v231_v8, 0.0  ;;  %v246_v12 = vadd.f32 %v311_v10, %v281_v3  ;;  %v240_v13 = vpop.f32.mrb[1].mxu1 }
 0x23d   :  { %v254_v14 = vadd.f32 %v250_v9, %v480_v1  ;;  %v241_v15 = vadd.f32 %v281_v3, %v240_v13 }
 0x23e   :  { %v253_v16 = vadd.f32 %v249_v11, %v478_v0  ;;  %v252_v17 = vmax.f32 %v246_v12, 0.0 }
 0x23f   :  { %258 = vst.msk [vmem:[#allocation7 + $0x8] sm:$0xff] %vm53_vm0, %v254_v14  ;;  %v251_v18 = vmax.f32 %v241_v15, 0.0 }
 0x240   :  { %257 = vst.msk [vmem:[#allocation7] sm:$0xff] %vm53_vm0, %v253_v16  ;;  %v256_v19 = vadd.f32 %v252_v17, %v488_v5 }
 0x241   :  { %v255_v20 = vadd.f32 %v251_v18, %v482_v2 }
 0x242   :  { %260 = vst.msk [vmem:[#allocation7 + $0x18] sm:$0xff] %vm53_vm0, %v256_v19 }
 0x243   :  { %259 = vst.msk [vmem:[#allocation7 + $0x10] sm:$0xff] %vm53_vm0, %v255_v20 }
 0x244   :  { %396 = shalt.err (!%p393_p6)
}
 0x245   :  { %s397_s25 = scalar_lea.hbm %s545_s5, 512 }
 0x246   :  { %p398_p7 = scmp.ne.s32.totalorder %s545_s5, %s397_s25  ;;  %p401_p8 = scmp.lt.u32.totalorder %s397_s25, %s545_s5 }
 0x248   :  { %p403_p9 = pnand %p401_p8, %p398_p7 }
 0x24a   :  { %406 = shalt.err (!%p403_p9)
}
 0x24b   :  { %272 = dma.vmem_to_hbm [thread:$0]  %s267_s22, 512, %s545_s5, [#allocation4], %s414_s28, %s414_s28, %s415_s29  }
 0x24c   :  { %411 = dma.done.wait [#allocation4], 512  }
 0x24d   :  { %412 = vsyncadd [#allocation4], 4294966784 }
 0x24e   :  { %276 = vsyncpa [#allocation3], 1 }
 0x24f   :  { %277 = vsyncpa [#allocation6], 1 }
 0x250   :  { %278 = vsyncpa [#allocation4], 1 }

</bundles_post_ra>
